<compile_context>
chip_gen: v6e
topology: v6e:2x2x1
jax: 0.10.0
libtpu: 0.0.40
codegen_flags: <defaults>
</compile_context>

<pallas_src>
import functools

import jax
import jax.numpy as jnp
from jax.experimental import pallas as pl
from jax.experimental.pallas import tpu as pltpu


def _round_up(n, m):
    return ((n + m - 1) // m) * m


def _cdiv(a, b):
    return -(-a // b)


def _default_vmem_budget_bytes():
    """Per-generation budget for the pipelined x/out buffers. Stays under the
    default scoped-VMEM limit (16 MiB on v5e, 32 MiB elsewhere; per-TC on v7x),
    so no vmem_limit_bytes override is needed."""
    try:
        kind = jax.devices()[0].device_kind.lower()
    except Exception:
        kind = ""
    if "v5 lite" in kind or "v5e" in kind or "v5lite" in kind:
        return 12 * 1024 * 1024
    if "v7" in kind:
        return 20 * 1024 * 1024   # 64 MiB physical per TC; both TCs pipeline
    return 24 * 1024 * 1024       # v6e / v5p / v4: 32 MiB scoped default


def _logreg_kernel(x_ref, w_ref, b_ref, o_ref, acc_ref):
    # x_ref: (8, rows, DK) VMEM     w_ref: (1, DK) VMEM, f32
    # b_ref: (1,) SMEM, f32         o_ref: (8, rows) VMEM, x dtype
    # acc_ref: (8, rows) f32 VMEM scratch, resident across the D-chunk axis.
    k = pl.program_id(1)

    @pl.when(k == 0)
    def _():
        acc_ref[...] = jnp.zeros_like(acc_ref)

    xw = x_ref[...].astype(jnp.float32) * w_ref[...]      # VPU broadcast multiply
    acc_ref[...] += jnp.sum(xw, axis=-1)                  # XLU cross-lane reduce

    @pl.when(k == pl.num_programs(1) - 1)
    def _():
        z = acc_ref[...] + b_ref[0]
        y = 0.5 * (jnp.tanh(0.5 * z) + 1.0)               # sigmoid via one EUP tanh
        o_ref[...] = y.astype(o_ref.dtype)                # lane-dense full-block store


@functools.partial(jax.jit, static_argnames=("vmem_budget_bytes",))
def logistic_regression(x, weight, bias, *, vmem_budget_bytes=None):
    """x: (B, D); weight: (1, D) (PyTorch nn.Linear layout); bias: (1,)."""
    B, D = x.shape
    out_dtype = x.dtype
    x_item = x.dtype.itemsize
    out_item = jnp.dtype(out_dtype).itemsize

    budget = (vmem_budget_bytes if vmem_budget_bytes is not None
              else _default_vmem_budget_bytes())
    D_lane = _round_up(D, 128)            # lane-padded feature width in VMEM

    def step_bytes(tb, dk):
        return (2 * tb * dk * x_item      # double-buffered x block
                + 2 * tb * out_item       # double-buffered output slab
                + 4 * tb                  # f32 accumulator scratch
                + 2 * 8 * dk * 4)         # double-buffered f32 weight row (sublane-padded)

    # Feature chunking: one chunk covering all of D unless even a modest 512-row
    # tile would blow the budget (very large D).
    DK = D_lane
    if step_bytes(512, DK) > budget:
        dk_cap = (budget - 2 * 512 * out_item - 4 * 512) // (2 * 512 * x_item + 2 * 8 * 4)
        DK = max(128, dk_cap // 128 * 128)
        if step_bytes(128, DK) > budget:
            DK = 128
    n_k = _cdiv(D_lane, DK)
    D_total = n_k * DK

    # Batch tile: as big as the budget allows (amortize per-step overhead), but
    # balance-divide the 128-padded batch and keep >= 2 tiles for v7x megacore.
    tb_cap = (budget - 2 * 8 * DK * 4) // (2 * DK * x_item + 2 * out_item + 4)
    TB_cap = max(128, min(32768, tb_cap // 128 * 128))
    B_pad = _round_up(B, 128)
    n_tiles = _cdiv(B_pad, TB_cap)
    if n_tiles == 1 and B_pad >= 256:
        n_tiles = 2                       # keep both TensorCores fed on v7x
    TB = _round_up(_cdiv(B_pad, n_tiles), 128)
    B_total = n_tiles * TB
    rows = TB // 8                        # lane dim of the per-tile output slab

    # Zero padding: junk batch rows compute sigmoid(b) and are sliced off; zero
    # feature columns contribute nothing to the dot product.
    x_p = jnp.pad(x, ((0, B_total - B), (0, D_total - D)))
    # Row-major-preserving reshape: batch row a*rows + r  ->  (a, r, :)
    x3 = x_p.reshape(8 * n_tiles, rows, D_total)
    w_row = jnp.pad(weight.reshape(1, D).astype(jnp.float32),
                    ((0, 0), (0, D_total - D)))
    b = bias.reshape(1).astype(jnp.float32)

    out = pl.pallas_call(
        _logreg_kernel,
        out_shape=jax.ShapeDtypeStruct((8 * n_tiles, rows), out_dtype),
        grid_spec=pltpu.PrefetchScalarGridSpec(
            num_scalar_prefetch=0,
            grid=(n_tiles, n_k),
            in_specs=[
                pl.BlockSpec((8, rows, DK), lambda i, k: (i, 0, k)),     # x tile
                pl.BlockSpec((1, DK), lambda i, k: (0, k)),              # weight slice
                pl.BlockSpec(memory_space=pltpu.MemorySpace.SMEM),       # bias scalar
            ],
            out_specs=pl.BlockSpec((8, rows), lambda i, k: (i, 0)),
            scratch_shapes=[pltpu.VMEM((8, rows), jnp.float32)],
        ),
        compiler_params=pltpu.CompilerParams(
            dimension_semantics=("parallel", "arbitrary")),
    )(x3, w_row, b)

    # Row-major flatten restores batch order; strip padding, restore (B, 1).
    return out.reshape(-1)[:B].reshape(B, 1)


if __name__ == "__main__":
    key = jax.random.PRNGKey(0)
    kx, kw, kb, kx2, kxc, kwc, kbc = jax.random.split(key, 7)

    def ref_fn(xv, w, bv):
        z = jnp.dot(xv, w.T, precision=jax.lax.Precision.HIGHEST) + bv
        return jax.nn.sigmoid(z)

    # ---- Small model (input_size=32), deterministic nn.Linear-style params.
    input_size = 32
    bound = 1.0 / jnp.sqrt(jnp.float32(input_size))
    weight = jax.random.uniform(kw, (1, input_size), dtype=jnp.float32,
                                minval=-bound, maxval=bound)
    bias = jax.random.uniform(kb, (1,), dtype=jnp.float32,
                              minval=-bound, maxval=bound)

    # Case 1: tiny batch (single tile, padded to 128 rows).
    x = jax.random.normal(kx, (8, input_size), dtype=jnp.float32)
    out = jax.block_until_ready(logistic_regression(x, weight, bias))
    assert out.shape == (8, 1) and out.dtype == x.dtype
    assert jnp.allclose(out, ref_fn(x, weight, bias), atol=1e-5, rtol=1e-5)

    # Case 2: larger batch exercising the balanced multi-tile "parallel" grid.
    x2 = jax.random.normal(kx2, (2056, input_size), dtype=jnp.float32)
    out2 = jax.block_until_ready(logistic_regression(x2, weight, bias))
    assert out2.shape == (2056, 1)
    assert jnp.allclose(out2, ref_fn(x2, weight, bias), atol=1e-5, rtol=1e-5)

    # Case 3: force the D-chunk accumulator path with a tiny VMEM budget.
    d_big = 512
    bound_c = 1.0 / jnp.sqrt(jnp.float32(d_big))
    weight_c = jax.random.uniform(kwc, (1, d_big), dtype=jnp.float32,
                                  minval=-bound_c, maxval=bound_c)
    bias_c = jax.random.uniform(kbc, (1,), dtype=jnp.float32,
                                minval=-bound_c, maxval=bound_c)
    xc = jax.random.normal(kxc, (300, d_big), dtype=jnp.float32)
    outc = jax.block_until_ready(
        logistic_regression(xc, weight_c, bias_c, vmem_budget_bytes=1 << 20))
    assert outc.shape == (300, 1)
    assert jnp.allclose(outc, ref_fn(xc, weight_c, bias_c), atol=1e-5, rtol=1e-5)

    print("KERNEL_OK")
</pallas_src>

<mosaic_0001>
module attributes {stable_mosaic.version = 11 : i64} {
  func.func @_logreg_kernel(%arg0: i32, %arg1: i32, %arg2: memref<8x16x128xf32, #tpu.memory_space<vmem>>, %arg3: memref<1x128xf32, #tpu.memory_space<vmem>>, %arg4: memref<1xf32, #tpu.memory_space<smem>>, %arg5: memref<8x16xf32, #tpu.memory_space<vmem>>, %arg6: memref<8x16xf32, #tpu.memory_space<vmem>>) attributes {dimension_semantics = [#tpu.dimension_semantics<parallel>, #tpu.dimension_semantics<arbitrary>], iteration_bounds = array<i64: 1, 1>, scalar_prefetch = 0 : i64, scratch_operands = 1 : i64, tpu.core_type = #tpu.core_type<tc>, window_params = [{transform_indices = @transform_0, window_bounds = array<i64: 8, 16, 128>}, {transform_indices = @transform_1, window_bounds = array<i64: 1, 128>}, {transform_indices = @transform_2, window_bounds = array<i64: 1>}, {transform_indices = @transform_3, window_bounds = array<i64: 8, 16>}]} {
    %c0_i32 = arith.constant 0 : i32
    %0 = arith.cmpi eq, %arg1, %c0_i32 : i32
    %1 = arith.extui %0 : i1 to i32
    %c0_i32_0 = arith.constant 0 : i32
    %2 = arith.cmpi ne, %1, %c0_i32_0 : i32
    scf.if %2 {
      %cst_11 = arith.constant 0.000000e+00 : f32
      %15 = vector.broadcast %cst_11 : f32 to vector<8x16xf32>
      %c0_12 = arith.constant 0 : index
      %c0_13 = arith.constant 0 : index
      %16 = vector.load %arg6[%c0_12, %c0_13] : memref<8x16xf32, #tpu.memory_space<vmem>>, vector<8x16xf32>
      tpu.vector_store %arg6[%c0_12, %c0_13], %15 {strides = array<i32>} : memref<8x16xf32, #tpu.memory_space<vmem>>, vector<8x16xf32>,
    } else {
    }
    %c0 = arith.constant 0 : index
    %c0_1 = arith.constant 0 : index
    %c0_2 = arith.constant 0 : index
    %3 = vector.load %arg2[%c0, %c0_1, %c0_2] : memref<8x16x128xf32, #tpu.memory_space<vmem>>, vector<8x16x128xf32>
    %c0_3 = arith.constant 0 : index
    %c0_4 = arith.constant 0 : index
    %4 = vector.load %arg3[%c0_3, %c0_4] : memref<1x128xf32, #tpu.memory_space<vmem>>, vector<1x128xf32>
    %5 = vector.shape_cast %4 : vector<1x128xf32> to vector<1x1x128xf32>
    %6 = vector.broadcast %5 : vector<1x1x128xf32> to vector<8x16x128xf32>
    %7 = arith.mulf %3, %6 : vector<8x16x128xf32>
    %c0_5 = arith.constant 0 : index
    %c0_6 = arith.constant 0 : index
    %8 = vector.load %arg6[%c0_5, %c0_6] : memref<8x16xf32, #tpu.memory_space<vmem>>, vector<8x16xf32>
    %cst = arith.constant dense<0.000000e+00> : vector<8x16xf32>
    %9 = vector.multi_reduction <add>, %7, %cst [2] : vector<8x16x128xf32> to vector<8x16xf32>
    %10 = arith.addf %8, %9 : vector<8x16xf32>
    %c0_7 = arith.constant 0 : index
    %c0_8 = arith.constant 0 : index
    %11 = vector.load %arg6[%c0_7, %c0_8] : memref<8x16xf32, #tpu.memory_space<vmem>>, vector<8x16xf32>
    tpu.vector_store %arg6[%c0_7, %c0_8], %10 {strides = array<i32>} : memref<8x16xf32, #tpu.memory_space<vmem>>, vector<8x16xf32>,
    %c0_i32_9 = arith.constant 0 : i32
    %12 = arith.cmpi eq, %arg1, %c0_i32_9 : i32
    %13 = arith.extui %12 : i1 to i32
    %c0_i32_10 = arith.constant 0 : i32
    %14 = arith.cmpi ne, %13, %c0_i32_10 : i32
    scf.if %14 {
      %c0_11 = arith.constant 0 : index
      %c0_12 = arith.constant 0 : index
      %15 = vector.load %arg6[%c0_11, %c0_12] : memref<8x16xf32, #tpu.memory_space<vmem>>, vector<8x16xf32>
      %c0_13 = arith.constant 0 : index
      %16 = memref.load %arg4[%c0_13] : memref<1xf32, #tpu.memory_space<smem>>
      %17 = vector.broadcast %16 : f32 to vector<8x16xf32>
      %18 = arith.addf %15, %17 : vector<8x16xf32>
      %cst_14 = arith.constant 5.000000e-01 : f32
      %19 = vector.broadcast %cst_14 : f32 to vector<8x16xf32>
      %20 = arith.mulf %19, %18 : vector<8x16xf32>
      %21 = math.tanh %20 : vector<8x16xf32>
      %cst_15 = arith.constant 1.000000e+00 : f32
      %22 = vector.broadcast %cst_15 : f32 to vector<8x16xf32>
      %23 = arith.addf %21, %22 : vector<8x16xf32>
      %cst_16 = arith.constant 5.000000e-01 : f32
      %24 = vector.broadcast %cst_16 : f32 to vector<8x16xf32>
      %25 = arith.mulf %24, %23 : vector<8x16xf32>
      %c0_17 = arith.constant 0 : index
      %c0_18 = arith.constant 0 : index
      %26 = vector.load %arg5[%c0_17, %c0_18] : memref<8x16xf32, #tpu.memory_space<vmem>>, vector<8x16xf32>
      tpu.vector_store %arg5[%c0_17, %c0_18], %25 {strides = array<i32>} : memref<8x16xf32, #tpu.memory_space<vmem>>, vector<8x16xf32>,
    } else {
    }
    return
  }
  func.func @transform_0(%arg0: i32, %arg1: i32) -> (i32, i32, i32) {
    %c0_i32 = arith.constant 0 : i32
    %c0_i32_0 = arith.constant 0 : i32
    return %arg0, %c0_i32, %arg1 : i32, i32, i32
  }
  func.func @transform_1(%arg0: i32, %arg1: i32) -> (i32, i32) {
    %c0_i32 = arith.constant 0 : i32
    %c0_i32_0 = arith.constant 0 : i32
    return %c0_i32, %arg1 : i32, i32
  }
  func.func @transform_2(%arg0: i32, %arg1: i32) -> i32 {
    %c0_i32 = arith.constant 0 : i32
    %c0_i32_0 = arith.constant 0 : i32
    return %c0_i32 : i32
  }
  func.func @transform_3(%arg0: i32, %arg1: i32) -> (i32, i32) {
    %c0_i32 = arith.constant 0 : i32
    %c0_i32_0 = arith.constant 0 : i32
    return %arg0, %c0_i32 : i32, i32
  }
}

</mosaic_0001>

<bundles_post_ra>
// kernel: logistic_regression.1
= control target key start
LH: loop header
LB: loop body
LE: loop exit
PB: predicated region body
PF: predicated region fallthrough
CT: control target
= control target key end

     0   :  { %vm19_vm0 = vcmask 130048   ;;  %v223_v33 = vmov 0.0   ;;  %v109_v38 = vlaneseq  ;;  %vm120_vm1 = vcmask 130112   ;;  %s312_s0 = inlined_call_operand.vmem [shape: f32[8,16,128], index: 0, kind: input, shape index: {}]   ;;  %s313_s1 = inlined_call_operand.vmem [shape: f32[1,128], index: 1, kind: input, shape index: {}]   ;;  %s314_s2 = inlined_call_operand.<no memory space> [shape: f32[1], index: 2, kind: input, shape index: {}]   ;;  %s315_s3 = inlined_call_operand.vmem [shape: f32[8,16], index: 3, kind: output, shape index: {}]  }
   0x1   :  { %v23_v0 = vld [vmem:[%s312_s0 + $0x10] sm:$0xff]  ;;  %v219_v1 = vld [vmem:[%s313_s1] ss:$0 sm:$0xff]  ;;  %v24_v5 = vld [vmem:[%s312_s0 + $0x18] sm:$0xff]  ;;  %20 = vst.msk [vmem:[#allocation2] sm:$0xff] %vm19_vm0, %v223_v33  ;;  %vm185_vm2 = vcmask 1041409  }
   0x2   :  { %v21_v2 = vld [vmem:[%s312_s0] sm:$0xff]  ;;  %v46_v3 = vmul.f32 %v219_v1, %v23_v0  ;;  %v22_v6 = vld [vmem:[%s312_s0 + $0x8] sm:$0xff]  ;;  %v47_v7 = vmul.f32 %v219_v1, %v24_v5  ;;  %v28_v13 = vld [vmem:[%s312_s0 + $0x38] sm:$0xff]  ;;  %v110_v41 = vand.u32 127, %v109_v38  ;;  %v112_v45 = vshrl.u32 %v109_v38, 7 }
   0x3   :  { %v44_v4 = vmul.f32 %v219_v1, %v21_v2  ;;  %v45_v8 = vmul.f32 %v219_v1, %v22_v6  ;;  %v26_v9 = vld [vmem:[%s312_s0 + $0x28] sm:$0xff]  ;;  %v25_v10 = vld [vmem:[%s312_s0 + $0x20] sm:$0xff]  ;;  %v27_v14 = vld [vmem:[%s312_s0 + $0x30] sm:$0xff]  ;;  %v51_v15 = vmul.f32 %v219_v1, %v28_v13  ;;  %vm187_vm3 = vcmask 1042434  }
   0x4   :  { %65 = vadd.xlane.f32.xlu1 %v46_v3  ;;  %v49_v11 = vmul.f32 %v219_v1, %v26_v9  ;;  %v48_v12 = vmul.f32 %v219_v1, %v25_v10  ;;  %v50_v16 = vmul.f32 %v219_v1, %v27_v14  ;;  %v30_v17 = vld [vmem:[%s312_s0 + $0x48] sm:$0xff]  ;;  %v29_v18 = vld [vmem:[%s312_s0 + $0x40] sm:$0xff]  ;;  %v32_v21 = vld [vmem:[%s312_s0 + $0x58] sm:$0xff]  ;;  %v115_v42 = vadd.s32 4294967288, %v110_v41 }
   0x5   :  { %61 = vadd.xlane.f32.xlu0 %v44_v4  ;;  %v53_v19 = vmul.f32 %v219_v1, %v30_v17  ;;  %v52_v20 = vmul.f32 %v219_v1, %v29_v18  ;;  %v31_v22 = vld [vmem:[%s312_s0 + $0x50] sm:$0xff]  ;;  %v55_v23 = vmul.f32 %v219_v1, %v32_v21  ;;  %v34_v25 = vld [vmem:[%s312_s0 + $0x68] sm:$0xff]  ;;  %v33_v26 = vld [vmem:[%s312_s0 + $0x60] sm:$0xff]  ;;  %v113_v49 = vsub.s32 %v110_v41, %v112_v45 }
   0x6   :  { %v54_v24 = vmul.f32 %v219_v1, %v31_v22  ;;  %v57_v27 = vmul.f32 %v219_v1, %v34_v25  ;;  %v56_v28 = vmul.f32 %v219_v1, %v33_v26  ;;  %v36_v29 = vld [vmem:[%s312_s0 + $0x78] sm:$0xff]  ;;  %v35_v30 = vld [vmem:[%s312_s0 + $0x70] sm:$0xff]  ;;  %v118_v46 = vsub.s32 %v115_v42, %v112_v45 }
   0x7   :  { %v59_v31 = vmul.f32 %v219_v1, %v36_v29  ;;  %v58_v32 = vmul.f32 %v219_v1, %v35_v30  ;;  %vm189_vm4 = vcmask 1043459   ;;  %vm191_vm5 = vcmask 1044484  }
   0x8   :  { %67 = vadd.xlane.f32.xlu1 %v47_v7  ;;  %vm193_vm6 = vcmask 1045509   ;;  %vm195_vm7 = vcmask 1046534   ;;  %vm197_vm8 = vcmask 1047559   ;;  %v208_v25 = vstv %s314_s2 }
   0x9   :  { %63 = vadd.xlane.f32.xlu0 %v45_v8 }
   0xc   :  { %71 = vadd.xlane.f32.xlu1 %v49_v11 }
   0xd   :  { %69 = vadd.xlane.f32.xlu0 %v48_v12 }
  0x10   :  { %75 = vadd.xlane.f32.xlu1 %v51_v15 }
  0x11   :  { %73 = vadd.xlane.f32.xlu0 %v50_v16 }
  0x14   :  { %79 = vadd.xlane.f32.xlu1 %v53_v19 }
  0x15   :  { %77 = vadd.xlane.f32.xlu0 %v52_v20  ;;  %v60_v20 = vld [vmem:[#allocation2] sm:$0xff] }
  0x18   :  { %83 = vadd.xlane.f32.xlu1 %v55_v23 }
  0x19   :  { %81 = vadd.xlane.f32.xlu0 %v54_v24 }
  0x1c   :  { %87 = vadd.xlane.f32.xlu1 %v57_v27 }
  0x1d   :  { %85 = vadd.xlane.f32.xlu0 %v56_v28 }
  0x20   :  { %91 = vadd.xlane.f32.xlu1 %v59_v31 }
  0x21   :  { %89 = vadd.xlane.f32.xlu0 %v58_v32 }
  0x8d   :  { %v66_v34 = vpop.xlane.xlu1 %65 }
  0x8e   :  { %v62_v35 = vpop.xlane.xlu0 %61  ;;  %v125_v56 = vrot.slane %v66_v34, %v113_v49 }
  0x8f   :  { %v114_v57 = vrot.slane %v62_v35, %v113_v49 }
  0x91   :  { %v68_v36 = vpop.xlane.xlu1 %67 }
  0x92   :  { %v64_v37 = vpop.xlane.xlu0 %63  ;;  %v129_v50 = vrot.slane %v68_v36, %v118_v46 }
  0x93   :  { %v119_v51 = vrot.slane %v64_v37, %v118_v46 }
  0x94   :  { %v130_v62 = vsel %vm120_vm1, %v129_v50, %v125_v56 }
  0x95   :  { %v72_v39 = vpop.xlane.xlu1 %71  ;;  %v121_v63 = vsel %vm120_vm1, %v119_v51, %v114_v57 }
  0x96   :  { %v70_v40 = vpop.xlane.xlu0 %69  ;;  %v138_v52 = vrot.slane %v72_v39, %v118_v46  ;;  %v186_v8 = vsel %vm185_vm2, %v130_v62, %v121_v63 }
  0x97   :  { %v134_v53 = vrot.slane %v70_v40, %v113_v49 }
  0x99   :  { %v76_v43 = vpop.xlane.xlu1 %75  ;;  %v139_v2 = vsel %vm120_vm1, %v138_v52, %v134_v53 }
  0x9a   :  { %v74_v44 = vpop.xlane.xlu0 %73  ;;  %v147_v58 = vrot.slane %v76_v43, %v118_v46  ;;  %v188_v10 = vsel %vm187_vm3, %v139_v2, %v186_v8 }
  0x9b   :  { %v143_v59 = vrot.slane %v74_v44, %v113_v49 }
  0x9d   :  { %v80_v47 = vpop.xlane.xlu1 %79  ;;  %v148_v5 = vsel %vm120_vm1, %v147_v58, %v143_v59 }
  0x9e   :  { %v78_v48 = vpop.xlane.xlu0 %77  ;;  %v156_v60 = vrot.slane %v80_v47, %v118_v46  ;;  %v190_v12 = vsel %vm189_vm4, %v148_v5, %v188_v10 }
  0x9f   :  { %v152_v61 = vrot.slane %v78_v48, %v113_v49 }
  0xa1   :  { %v84_v54 = vpop.xlane.xlu1 %83  ;;  %v157_v9 = vsel %vm120_vm1, %v156_v60, %v152_v61 }
  0xa2   :  { %v82_v55 = vpop.xlane.xlu0 %81  ;;  %v165_v0 = vrot.slane %v84_v54, %v118_v46  ;;  %v192_v16 = vsel %vm191_vm5, %v157_v9, %v190_v12 }
  0xa3   :  { %v161_v1 = vrot.slane %v82_v55, %v113_v49 }
  0xa5   :  { %v88_v3 = vpop.xlane.xlu1 %87  ;;  %v166_v11 = vsel %vm120_vm1, %v165_v0, %v161_v1 }
  0xa6   :  { %v86_v4 = vpop.xlane.xlu0 %85  ;;  %v174_v6 = vrot.slane %v88_v3, %v118_v46  ;;  %v194_v19 = vsel %vm193_vm6, %v166_v11, %v192_v16 }
  0xa7   :  { %v170_v7 = vrot.slane %v86_v4, %v113_v49 }
  0xa9   :  { %v175_v13 = vsel %vm120_vm1, %v174_v6, %v170_v7  ;;  %v92_v14 = vpop.xlane.xlu1 %91 }
  0xaa   :  { %v90_v15 = vpop.xlane.xlu0 %89  ;;  %v183_v17 = vrot.slane %v92_v14, %v118_v46  ;;  %v196_v21 = vsel %vm195_vm7, %v175_v13, %v194_v19 }
  0xab   :  { %v179_v18 = vrot.slane %v90_v15, %v113_v49 }
  0xad   :  { %v184_v22 = vsel %vm120_vm1, %v183_v17, %v179_v18 }
  0xae   :  { %v198_v23 = vsel %vm197_vm8, %v184_v22, %v196_v21 }
  0xaf   :  { %v200_v24 = vadd.f32 %v198_v23, %v60_v20 }
  0xb1   :  { %202 = vst.msk [vmem:[#allocation2] sm:$0xff] %vm19_vm0, %v200_v24 }
  0xb8   :  { %v206_v26 = vld [vmem:[#allocation2] sm:$0xff] }
  0xb9   :  { %v209_v27 = vadd.f32 %v208_v25, %v206_v26 }
  0xbb   :  { %v210_v28 = vmul.f32 0.5, %v209_v27 }
  0xbd   :  { %221 = vtanh.f32 %v210_v28 }
  0xca   :  { %v222_v29 = vpop.eup %221 }
  0xcb   :  { %v212_v30 = vadd.f32 1.0, %v222_v29 }
  0xcd   :  { %v213_v31 = vmul.f32 0.5, %v212_v30 }
  0xcf   :  { %214 = vst.msk [vmem:[%s315_s3] sm:$0xff] %vm19_vm0, %v213_v31 }

</bundles_post_ra>
